<compile_context>
chip_gen: v5e
topology: v5e:2x2
jax: 0.10.0
libtpu: 0.0.40
codegen_flags: <defaults>
</compile_context>

<pallas_src>
import jax
import jax.numpy as jnp
from jax import lax
from jax.experimental import pallas as pl
from jax.experimental.pallas import tpu as pltpu

_EPS = 1e-5
_LANE = 128
_SUBLANE = 8
# Fits v5e's 16 MiB default scoped VMEM (and v7x's 64 MiB physical) with
# headroom; no vmem_limit_bytes override needed on any generation.
_VMEM_BUDGET = 12 * 1024 * 1024
_MAX_TILE = 8192
_MIN_STEPS = 8          # >= ~4 grid steps per TensorCore on v7x megacore


# ---------------------------------------------------------------------------
# Kernels: channels-first 4-D path.  Block = (1, C, TILE); reduce over C
# (sublane axis); per-pixel normalization is lane-independent.
# ---------------------------------------------------------------------------
def _cf_kernel_with_bias(x_ref, w_ref, b_ref, o_ref):
    x = x_ref[0].astype(jnp.float32)                    # (C, T)
    mu = jnp.mean(x, axis=0, keepdims=True)             # (1, T) sublane reduce
    xc = x - mu
    var = jnp.mean(xc * xc, axis=0, keepdims=True)      # unbiased=False variance
    inv = lax.rsqrt(var + _EPS)                         # EUP rsqrt
    o_ref[0] = (xc * inv * w_ref[...] + b_ref[...]).astype(o_ref.dtype)


def _cf_kernel_bias_free(x_ref, w_ref, o_ref):
    x = x_ref[0].astype(jnp.float32)                    # (C, T)
    mu = jnp.mean(x, axis=0, keepdims=True)
    xc = x - mu
    var = jnp.mean(xc * xc, axis=0, keepdims=True)      # var uses mu ...
    inv = lax.rsqrt(var + _EPS)
    o_ref[0] = (x * inv * w_ref[...]).astype(o_ref.dtype)   # ... output does not


# ---------------------------------------------------------------------------
# Kernels: generic last-dim path (non-4-D branch of the module).
# Block = (TILE_R, N); reduce over the lane axis (XLU), rows are independent.
# ---------------------------------------------------------------------------
def _rw_kernel_with_bias(x_ref, w_ref, b_ref, o_ref):
    x = x_ref[...].astype(jnp.float32)                  # (TR, N)
    mu = jnp.mean(x, axis=-1, keepdims=True)            # lane reduce
    xc = x - mu
    var = jnp.mean(xc * xc, axis=-1, keepdims=True)
    inv = lax.rsqrt(var + _EPS)
    o_ref[...] = (xc * inv * w_ref[...] + b_ref[...]).astype(o_ref.dtype)


def _rw_kernel_bias_free(x_ref, w_ref, o_ref):
    x = x_ref[...].astype(jnp.float32)
    mu = jnp.mean(x, axis=-1, keepdims=True)
    xc = x - mu
    var = jnp.mean(xc * xc, axis=-1, keepdims=True)
    inv = lax.rsqrt(var + _EPS)
    o_ref[...] = (x * inv * w_ref[...]).astype(o_ref.dtype)


# ---------------------------------------------------------------------------
# Tile selection from a VMEM budget.
# Per lane/row cost ~= double-buffered (in + out) blocks + ~4 f32 temporaries.
# ---------------------------------------------------------------------------
def _pick_spatial_tile(L, C, B, itemsize):
    l_round = pl.cdiv(L, _LANE) * _LANE
    per_lane = C * (4 * itemsize + 4 * 4)
    tile = max(_LANE, min(_MAX_TILE, _VMEM_BUDGET // per_lane, l_round))
    tile = (tile // _LANE) * _LANE
    # Keep enough grid steps for pipeline overlap / megacore balance.
    while tile > _LANE and B * pl.cdiv(L, tile) < _MIN_STEPS:
        tile -= _LANE
    return tile


def _pick_row_tile(R, N, itemsize):
    per_row = N * (4 * itemsize + 4 * 4)
    cap = max(_SUBLANE, min(1024, _VMEM_BUDGET // per_row))
    cap = min(cap, pl.cdiv(R, _SUBLANE) * _SUBLANE)
    tile = max(_SUBLANE, (cap // _SUBLANE) * _SUBLANE)
    while tile > _SUBLANE and pl.cdiv(R, tile) < _MIN_STEPS:
        tile -= _SUBLANE
    if tile >= R:
        return R        # single full-extent block (always a legal block shape)
    return tile


# ---------------------------------------------------------------------------
# Wrappers
# ---------------------------------------------------------------------------
def _ln_channels_first(x3, weight, bias):
    """x3: (B, C, L); normalize each (b, :, l) column over C. Returns (B, C, L)."""
    B, C, L = x3.shape
    with_bias = bias is not None
    w2 = weight.astype(jnp.float32).reshape(C, 1)

    tile = _pick_spatial_tile(L, C, B, x3.dtype.itemsize)
    grid = (B, pl.cdiv(L, tile))

    x_spec = pl.BlockSpec((1, C, tile), lambda b, t: (b, 0, t))
    w_spec = pl.BlockSpec((C, 1), lambda b, t: (0, 0))

    if with_bias:
        b2 = bias.astype(jnp.float32).reshape(C, 1)
        kernel, in_specs, args = _cf_kernel_with_bias, [x_spec, w_spec, w_spec], (x3, w2, b2)
    else:
        kernel, in_specs, args = _cf_kernel_bias_free, [x_spec, w_spec], (x3, w2)

    return pl.pallas_call(
        kernel,
        out_shape=jax.ShapeDtypeStruct((B, C, L), x3.dtype),
        grid_spec=pltpu.PrefetchScalarGridSpec(
            num_scalar_prefetch=0,
            grid=grid,
            in_specs=in_specs,
            out_specs=pl.BlockSpec((1, C, tile), lambda b, t: (b, 0, t)),
        ),
        compiler_params=pltpu.CompilerParams(
            dimension_semantics=("parallel", "parallel")),
    )(*args)


def _ln_last_dim(x2, weight, bias):
    """x2: (R, N); normalize each row over the last dim. Returns (R, N)."""
    R, N = x2.shape
    with_bias = bias is not None
    w2 = weight.astype(jnp.float32).reshape(1, N)

    tile = _pick_row_tile(R, N, x2.dtype.itemsize)
    grid = (pl.cdiv(R, tile),)

    x_spec = pl.BlockSpec((tile, N), lambda r: (r, 0))
    w_spec = pl.BlockSpec((1, N), lambda r: (0, 0))

    if with_bias:
        b2 = bias.astype(jnp.float32).reshape(1, N)
        kernel, in_specs, args = _rw_kernel_with_bias, [x_spec, w_spec, w_spec], (x2, w2, b2)
    else:
        kernel, in_specs, args = _rw_kernel_bias_free, [x_spec, w_spec], (x2, w2)

    return pl.pallas_call(
        kernel,
        out_shape=jax.ShapeDtypeStruct((R, N), x2.dtype),
        grid_spec=pltpu.PrefetchScalarGridSpec(
            num_scalar_prefetch=0,
            grid=grid,
            in_specs=in_specs,
            out_specs=pl.BlockSpec((tile, N), lambda r: (r, 0)),
        ),
        compiler_params=pltpu.CompilerParams(
            dimension_semantics=("parallel",)),
    )(*args)


def layer_norm(x, weight, bias=None, ln_type="WithBias"):
    """Matches LayerNorm.forward of the PyTorch module."""
    if ln_type == "BiasFree":
        b = None
    else:
        b = bias if bias is not None else jnp.zeros_like(weight)

    if x.ndim == 4:
        B, C, H, W = x.shape
        # NCHW kept in place: (B, C, H*W) reshape is free, reduce over C.
        y = _ln_channels_first(x.reshape(B, C, H * W), weight, b)
        return y.reshape(B, C, H, W)

    # Non-4D path: normalize over the last dim with a lane-reduce kernel
    # (no swapaxes / HBM transposes).
    shp = x.shape
    y = _ln_last_dim(x.reshape(-1, shp[-1]), weight, b)
    return y.reshape(shp)


# ---------------------------------------------------------------------------
# Pure-JAX references (follow the PyTorch code exactly)
# ---------------------------------------------------------------------------
def _ref_layer_norm_4d(x, weight, bias, ln_type):
    B, C, H, W = x.shape
    x3 = x.reshape(B, C, H * W).transpose(0, 2, 1)          # to_3d: (B, HW, C)
    mu = jnp.mean(x3, axis=-1, keepdims=True)
    var = jnp.mean((x3 - mu) ** 2, axis=-1, keepdims=True)
    if ln_type == "BiasFree":
        y3 = x3 / jnp.sqrt(var + _EPS) * weight
    else:
        y3 = (x3 - mu) / jnp.sqrt(var + _EPS) * weight + bias
    return y3.transpose(0, 2, 1).reshape(B, C, H, W)        # to_4d


def _ref_layer_norm_nd(x, weight, bias, ln_type):
    mu = jnp.mean(x, axis=-1, keepdims=True)
    var = jnp.mean((x - mu) ** 2, axis=-1, keepdims=True)
    if ln_type == "BiasFree":
        return x / jnp.sqrt(var + _EPS) * weight
    return (x - mu) / jnp.sqrt(var + _EPS) * weight + bias


if __name__ == "__main__":
    # Small shapes consistent with the module: B=2, dim(C)=32, H=W=16.
    B, C, H, W = 2, 32, 16, 16

    key = jax.random.PRNGKey(0)
    kx, kw, kb, kx3 = jax.random.split(key, 4)
    x = jax.random.normal(kx, (B, C, H, W), dtype=jnp.float32)
    weight = 1.0 + 0.1 * jax.random.normal(kw, (C,), dtype=jnp.float32)
    bias = 0.1 * jax.random.normal(kb, (C,), dtype=jnp.float32)

    # 4-D path, WithBias.
    out_wb = jax.block_until_ready(layer_norm(x, weight, bias, ln_type="WithBias"))
    ref_wb = _ref_layer_norm_4d(x, weight, bias, "WithBias")
    assert out_wb.shape == (B, C, H, W), out_wb.shape
    assert jnp.allclose(out_wb, ref_wb, atol=1e-4, rtol=1e-4)

    # 4-D path, BiasFree.
    out_bf = jax.block_until_ready(layer_norm(x, weight, None, ln_type="BiasFree"))
    ref_bf = _ref_layer_norm_4d(x, weight, None, "BiasFree")
    assert out_bf.shape == (B, C, H, W), out_bf.shape
    assert jnp.allclose(out_bf, ref_bf, atol=1e-4, rtol=1e-4)

    # Non-4-D path (module's else-branch): (B, seq, C) normalized over last dim.
    x3 = jax.random.normal(kx3, (B, 8, C), dtype=jnp.float32)
    out3 = jax.block_until_ready(layer_norm(x3, weight, bias, ln_type="WithBias"))
    ref3 = _ref_layer_norm_nd(x3, weight, bias, "WithBias")
    assert out3.shape == x3.shape
    assert jnp.allclose(out3, ref3, atol=1e-4, rtol=1e-4)

    out3_bf = jax.block_until_ready(layer_norm(x3, weight, None, ln_type="BiasFree"))
    ref3_bf = _ref_layer_norm_nd(x3, weight, None, "BiasFree")
    assert jnp.allclose(out3_bf, ref3_bf, atol=1e-4, rtol=1e-4)

    print("KERNEL_OK")
</pallas_src>

<mosaic_0001>
module attributes {stable_mosaic.version = 11 : i64} {
  func.func @_cf_kernel_with_bias(%arg0: i32, %arg1: i32, %arg2: memref<1x32x128xf32, #tpu.memory_space<vmem>>, %arg3: memref<32x1xf32, #tpu.memory_space<vmem>>, %arg4: memref<32x1xf32, #tpu.memory_space<vmem>>, %arg5: memref<1x32x128xf32, #tpu.memory_space<vmem>>) attributes {dimension_semantics = [#tpu.dimension_semantics<parallel>, #tpu.dimension_semantics<parallel>], iteration_bounds = array<i64: 2, 2>, scalar_prefetch = 0 : i64, scratch_operands = 0 : i64, tpu.core_type = #tpu.core_type<tc>, window_params = [{transform_indices = @transform_0, window_bounds = array<i64: 1, 32, 128>}, {pipeline_mode = #tpu.pipeline_mode<synchronous>, transform_indices = @transform_1, window_bounds = array<i64: 32, 1>}, {pipeline_mode = #tpu.pipeline_mode<synchronous>, transform_indices = @transform_2, window_bounds = array<i64: 32, 1>}, {transform_indices = @transform_3, window_bounds = array<i64: 1, 32, 128>}]} {
    %c0 = arith.constant 0 : index
    %c0_0 = arith.constant 0 : index
    %c0_1 = arith.constant 0 : index
    %0 = vector.load %arg2[%c0, %c0_0, %c0_1] : memref<1x32x128xf32, #tpu.memory_space<vmem>>, vector<1x32x128xf32>
    %1 = vector.shape_cast %0 : vector<1x32x128xf32> to vector<32x128xf32>
    %cst = arith.constant dense<0.000000e+00> : vector<128xf32>
    %2 = vector.multi_reduction <add>, %1, %cst [0] : vector<32x128xf32> to vector<128xf32>
    %3 = vector.shape_cast %2 : vector<128xf32> to vector<1x128xf32>
    %cst_2 = arith.constant 3.200000e+01 : f32
    %4 = vector.broadcast %cst_2 : f32 to vector<1x128xf32>
    %5 = arith.divf %3, %4 : vector<1x128xf32>
    %6 = vector.broadcast %5 : vector<1x128xf32> to vector<32x128xf32>
    %7 = arith.subf %1, %6 : vector<32x128xf32>
    %8 = arith.mulf %7, %7 : vector<32x128xf32>
    %cst_3 = arith.constant dense<0.000000e+00> : vector<128xf32>
    %9 = vector.multi_reduction <add>, %8, %cst_3 [0] : vector<32x128xf32> to vector<128xf32>
    %10 = vector.shape_cast %9 : vector<128xf32> to vector<1x128xf32>
    %cst_4 = arith.constant 3.200000e+01 : f32
    %11 = vector.broadcast %cst_4 : f32 to vector<1x128xf32>
    %12 = arith.divf %10, %11 : vector<1x128xf32>
    %cst_5 = arith.constant 9.99999974E-6 : f32
    %13 = vector.broadcast %cst_5 : f32 to vector<1x128xf32>
    %14 = arith.addf %12, %13 : vector<1x128xf32>
    %15 = math.rsqrt %14 : vector<1x128xf32>
    %16 = vector.broadcast %15 : vector<1x128xf32> to vector<32x128xf32>
    %17 = arith.mulf %7, %16 : vector<32x128xf32>
    %c0_6 = arith.constant 0 : index
    %c0_7 = arith.constant 0 : index
    %18 = vector.load %arg3[%c0_6, %c0_7] : memref<32x1xf32, #tpu.memory_space<vmem>>, vector<32x1xf32>
    %19 = vector.broadcast %18 : vector<32x1xf32> to vector<32x128xf32>
    %20 = arith.mulf %17, %19 : vector<32x128xf32>
    %c0_8 = arith.constant 0 : index
    %c0_9 = arith.constant 0 : index
    %21 = vector.load %arg4[%c0_8, %c0_9] : memref<32x1xf32, #tpu.memory_space<vmem>>, vector<32x1xf32>
    %22 = vector.broadcast %21 : vector<32x1xf32> to vector<32x128xf32>
    %23 = arith.addf %20, %22 : vector<32x128xf32>
    %c0_10 = arith.constant 0 : index
    %c0_11 = arith.constant 0 : index
    %c0_12 = arith.constant 0 : index
    %24 = vector.load %arg5[%c0_10, %c0_11, %c0_12] : memref<1x32x128xf32, #tpu.memory_space<vmem>>, vector<1x32x128xf32>
    %25 = vector.shape_cast %24 : vector<1x32x128xf32> to vector<32x128xf32>
    %26 = vector.shape_cast %23 : vector<32x128xf32> to vector<1x32x128xf32>
    tpu.vector_store %arg5[%c0_10, %c0_11, %c0_12], %26 {strides = array<i32>} : memref<1x32x128xf32, #tpu.memory_space<vmem>>, vector<1x32x128xf32>,
    return
  }
  func.func @transform_0(%arg0: i32, %arg1: i32) -> (i32, i32, i32) {
    %c0_i32 = arith.constant 0 : i32
    %c0_i32_0 = arith.constant 0 : i32
    return %arg0, %c0_i32, %arg1 : i32, i32, i32
  }
  func.func @transform_1(%arg0: i32, %arg1: i32) -> (i32, i32) {
    %c0_i32 = arith.constant 0 : i32
    %c0_i32_0 = arith.constant 0 : i32
    %c0_i32_1 = arith.constant 0 : i32
    return %c0_i32, %c0_i32_0 : i32, i32
  }
  func.func @transform_2(%arg0: i32, %arg1: i32) -> (i32, i32) {
    %c0_i32 = arith.constant 0 : i32
    %c0_i32_0 = arith.constant 0 : i32
    %c0_i32_1 = arith.constant 0 : i32
    return %c0_i32, %c0_i32_0 : i32, i32
  }
  func.func @transform_3(%arg0: i32, %arg1: i32) -> (i32, i32, i32) {
    %c0_i32 = arith.constant 0 : i32
    %c0_i32_0 = arith.constant 0 : i32
    return %arg0, %c0_i32, %arg1 : i32, i32, i32
  }
}

</mosaic_0001>

<bundles_post_ra>
// kernel: tpu_custom_call.1
= control target key start
LH: loop header
LB: loop body
LE: loop exit
PB: predicated region body
PF: predicated region fallthrough
CT: control target
= control target key end

     0   :  { %8 = vsyncpa [#allocation3], 0  ;;  %s863_s0 = inlined_call_operand.hbm [shape: f32[2,32,256], index: 0, kind: input, shape index: {}]   ;;  %s864_s1 = inlined_call_operand.vmem [shape: f32[32,1], index: 1, kind: input, shape index: {}]   ;;  %s865_s2 = inlined_call_operand.vmem [shape: f32[32,1], index: 2, kind: input, shape index: {}]   ;;  %s866_s3 = inlined_call_operand.hbm [shape: f32[2,32,256], index: 3, kind: output, shape index: {}]  }
   0x1   :  { %10 = vsyncpa [#allocation3 + $0x1], 0 }
   0x2   :  { %11 = vsyncpa [#allocation4], 0 }
   0x3   :  { %13 = vsyncpa [#allocation4 + $0x1], 0  ;;  %s693_s12 = smov 0   ;;  %s695_s13 = smov 0  }
   0x4   :  { %s697_s14 = smov 0   ;;  %s699_s15 = smov 0  }
   0x5   :  { %s701_s16 = smov 0   ;;  %s703_s17 = smov 0  }
   0x6   :  { %s705_s18 = smov 0   ;;  %s707_s19 = smov 0  }
   0x7 LB: > { %s427_s20 = sadd.s32 4294967295, %s663_s19   ;;  %s428_s21 = sadd.s32 4294967294, %s663_s19   ;;  %s663_s19 = sphi %s707_s19, %s19_s19   ;;  %s659_s18 = sphi %s705_s18, %s885_s18   ;;  %s655_s17 = sphi %s703_s17, %s884_s17   ;;  %s651_s16 = sphi %s701_s16, %s883_s16   ;;  %s647_s15 = sphi %s699_s15, %s882_s15   ;;  %s643_s14 = sphi %s697_s14, %s881_s14   ;;  %s639_s13 = sphi %s695_s13, %s880_s13   ;;  %s635_s12 = sphi %s693_s12, %s879_s12  }
   0x8   : > { %s28_s22 = sadd.s32 1, %s655_s17  ;;  %s31_s23 = sadd.s32 1, %s659_s18 }
   0x9   : > { %p29_p0 = scmp.ge.s32.totalorder %s28_s22, 2  ;;  %s40_s24 = sadd.s32 1, %s643_s14 }
   0xa   : > { %p47_p1 = scmp.ne.s32.totalorder %s643_s14, %s639_s13  ;;  %p48_p2 = scmp.eq.s32.totalorder %s663_s19, 0 }
   0xb   : > { %s887_s22 = smov (%p29_p0, %s28_s22), 0  ;;  %s889_s23 = smov (!%p29_p0, %s31_s23), %s659_s18 }
   0xc   : > { %869 = sst [smem:[#allocation8_spill]] %s887_s22  ;;  %s36_s25 = ssub.s32 %s655_s17, %s887_s22 }
   0xd   : > { %p746_p3 = por %p48_p2, %p47_p1  ;;  %p33_p4 = scmp.ge.s32.totalorder %s889_s23, 2 }
   0xe   : > { %p53_p5 = scmp.ne.s32.totalorder %s639_s13, %s635_s12  ;;  %p54_p6 = scmp.eq.s32.totalorder %s427_s20, 0 }
   0xf   : > { %p121_p7 = scmp.eq.s32.totalorder %s427_s20, 3  ;;  %s891_s23 = smov (%p33_p4, %s889_s23), 0 }
  0x10   : > { %871 = sst [smem:[#allocation9_spill]] %s891_s23  ;;  %p754_p8 = por %p54_p6, %p53_p5 }
  0x11   : > { %p758_p9 = por %p121_p7, %p47_p1  ;;  %s35_s29 = ssub.s32 %s659_s18, %s891_s23 }
  0x12   : > { %p127_p10 = scmp.eq.s32.totalorder %s428_s21, 3  ;;  %s37_s30 = sor.u32 %s36_s25, %s35_s29 }
  0x13   : > { %p38_p11 = scmp.eq.s32.totalorder %s37_s30, 0  ;;  %p454_p13 = scmp.lt.s32.totalorder %s663_s19, 4 }
  0x14   : > { %p764_p12 = por %p127_p10, %p53_p5  ;;  %s153_s5 = sand.u32 1, %s643_s14  }
  0x15   : > { %s771_s6 = scalar_select %p38_p11, %s643_s14, %s40_s24  }
  0x16   : > { %s431_s7 = sshll.u32 %s153_s5, 5  ;;  %s432_s8 = sshll.u32 %s659_s18, 3 }
  0x17   : > { %875 = sst [smem:[#allocation10_spill]] %s771_s6  ;;  %s161_s9 = sadd.s32 %s655_s17, %s432_s8 }
  0x18   : > { %s157_s10 = scalar_lea.vmem [#allocation2], %s431_s7  ;;  %s433_s20 = sshll.u32 %s161_s9, 3 }
  0x19   : > { %s166_s11 = sshll.u32 %s157_s10, 4  ;;  %s163_s29 = scalar_lea.hbm %s863_s0, %s433_s20  ;;  %s167_s11 = int_to_ptr.vmem [resolvable:$true] %s166_s11 }
  0x1a   : > { %p447_p0 = pnand %p454_p13, %p746_p3  ;;  %s164_s30 = sshll.u32 %s163_s29, 4  ;;  %s165_s30 = int_to_ptr.hbm [resolvable:$true] %s164_s30 }
  0x1b   : > { %s154_s23 = scalar_lea.sflag [#allocation3], %s153_s5  ;;  %s665_s24 = smov 256  }
  0x1c   : > { %s666_s22 = smov 128   ;;  %s667_s6 = smov 8  }
  0x1d   : > { %449 = dma.hbm_to_vmem [thread:$0]  (!%p447_p0), %s165_s30, 512, %s167_s11, %s154_s23, %s665_s24, %s666_s22, %s667_s6  }
  0x1e   : > { %p434_p1 = scmp.ge.s32.totalorder %s663_s19, 1  ;;  %p174_p2 = scmp.lt.s32.totalorder %s663_s19, 5 }
  0x20   : > { %p175_p4 = pnand %p434_p1, %p174_p2 }
  0x21   : > { %s783_s7 = sand.u32 (!%p175_p4), 1, %s639_s13  }
  0x22   : > { %178 = sbr.rel (%p175_p4) target bundleno = 181 (0xb5), region = 32  ;;  %s435_s26 = sshll.u32 (!%p175_p4), %s783_s7, 5 }
  0x23   : > { %s181_s8 = scalar_lea.sflag (!%p175_p4), [#allocation3], %s783_s7  ;;  %s184_s9 = scalar_lea.vmem (!%p175_p4), [#allocation2], %s435_s26 }
  0x27   : > { %626 = dma.done.wait (%p754_p8), %s181_s8, 512  }
  0x28   : > { %628 = vsyncadd (%p754_p8), %s181_s8, 4294966784  ;;  %v668_v0 = vmov 0   ;;  %v264_v1 = vld [vmem:[%s864_s1 + $0x10] sm:$0xff]  ;;  %v262_v2 = vld [vmem:[%s864_s1] sm:$0xff]  ;;  %v669_v13 = vmov 32.0   ;;  %s207_s5 = scalar_lea.vmem [#allocation5], %s435_s26 }
  0x29   : > { %529 = vset.pattern.permute.xlu1 %v668_v0  ;;  %528 = vset.pattern.permute.xlu0 %v668_v0  ;;  %v290_v3 = vld [vmem:[%s865_s2] sm:$0xff]  ;;  %v265_v4 = vld [vmem:[%s864_s1 + $0x18] sm:$0xff]  ;;  %v263_v5 = vld [vmem:[%s864_s1 + $0x8] sm:$0xff]  ;;  %531 = vrcp.f32 %v669_v13  ;;  %s585_s24 = scalar_lea.hbm %s866_s3, 128 }
  0x2a   : > { %530 = vset.pattern.permute.xlu2 %v668_v0  ;;  %278 = vperm.xlu1 %529, %v264_v1   ;;  %v291_v6 = vld [vmem:[%s865_s2 + $0x8] sm:$0xff]  ;;  %v293_v7 = vld [vmem:[%s865_s2 + $0x18] sm:$0xff]  ;;  %v292_v8 = vld [vmem:[%s865_s2 + $0x10] sm:$0xff] }
  0x2b   : > { %268 = vperm.xlu0 %528, %v262_v2   ;;  %296 = vperm.xlu2 %530, %v290_v3   ;;  %v208_v9 = vld [vmem:[%s184_s9] sm:$0xff]  ;;  %v209_v10 = vld [vmem:[%s184_s9 + $0x8] sm:$0xff]  ;;  %v210_v12 = vld [vmem:[%s184_s9 + $0x10] sm:$0xff] }
  0x2c   : > { %v212_v11 = vadd.f32 %v209_v10, %v208_v9  ;;  %v211_v15 = vld [vmem:[%s184_s9 + $0x18] sm:$0xff]  ;;  %s438_s9 = sshll.u32 %s651_s16, 3  ;;  %s336_s16 = sshll.u32 %s207_s5, 4  ;;  %s337_s16 = int_to_ptr.vmem [resolvable:$true] %s336_s16 }
  0x2d   : > { %s333_s6 = sadd.s32 %s647_s15, %s438_s9  ;;  %s323_s15 = scalar_lea.sflag [#allocation4], %s783_s7 }
  0x2e   : > { %v213_v14 = vadd.f32 %v212_v11, %v210_v12  ;;  %s439_s10 = sshll.u32 %s333_s6, 3 }
  0x2f   : > { %v532_v18 = vpop.eup %531  ;;  %s335_s20 = scalar_lea.hbm %s866_s3, %s439_s10 }
  0x30   : > { %v214_v16 = vadd.f32 %v213_v14, %v211_v15  ;;  %v222_v20 = vmul.f32 32.0, %v532_v18  ;;  %vm226_vm0 = vweird.f32 %v532_v18  ;;  %s338_s21 = sshll.u32 %s335_s20, 4  ;;  %s339_s21 = int_to_ptr.hbm [resolvable:$true] %s338_s21 }
  0x31   : > { %s579_s26 = sshra.s32 %s339_s21, 4  ;;  %s580_s26 = int_to_ptr.hbm [resolvable:$true] %s579_s26 }
  0x32   : > { %283 = vperm.xlu1 %529, %v265_v4   ;;  %v215_v17 = vrot.slane %v214_v16, 4  ;;  %v223_v22 = vsub.f32 1.0, %v222_v20  ;;  %s581_s25 = scalar_lea.hbm %s580_s26, 32  ;;  %p586_p7 = scmp.lt.s32.totalorder %s580_s26, %s866_s3 }
  0x33   : > { %273 = vperm.xlu0 %528, %v263_v5   ;;  %301 = vperm.xlu2 %530, %v291_v6   ;;  %p582_p3 = scmp.ne.s32.totalorder %s580_s26, %s581_s25  ;;  %p587_p8 = scmp.lt.s32.totalorder %s585_s24, %s581_s25 }
  0x34   : > { %v216_v19 = vadd.f32 %v215_v17, %v214_v16  ;;  %v224_v24 = vmul.f32 %v532_v18, %v223_v22 }
  0x35   : > { %p583_p5 = pnand %p582_p3, %p758_p9  ;;  %p588_p10 = por %p587_p8, %p586_p7 }
  0x36   : > { %v217_v21 = vrot.slane %v216_v19, 2  ;;  %v225_v26 = vadd.f32 %v532_v18, %v224_v24 }
  0x37   : > { %p584_p6 = pneg %p583_p5 }
  0x38   : > { %v218_v23 = vadd.f32 %v217_v21, %v216_v19  ;;  %v227_v28 = vsel %vm226_vm0, %v532_v18, %v225_v26 }
  0x39   : > { %p589_p11 = pnand %p588_p10, %p584_p6 }
  0x3a   : > { %311 = vperm.xlu1 %529, %v293_v7   ;;  %v219_v25 = vrot.slane %v218_v23, 1 }
  0x3b   : > { %306 = vperm.xlu0 %528, %v292_v8  }
  0x3c   : > { %v220_v27 = vadd.f32 %v219_v25, %v218_v23 }
  0x3e   : > { %v228_v29 = vmul.f32 %v227_v28, %v220_v27 }
  0x40   : > { %v229_v30 = vsub.f32 %v208_v9, %v228_v29  ;;  %v230_v31 = vsub.f32 %v209_v10, %v228_v29  ;;  %v231_v32 = vsub.f32 %v210_v12, %v228_v29  ;;  %v232_v35 = vsub.f32 %v211_v15, %v228_v29 }
  0x42   : > { %v233_v33 = vmul.f32 %v229_v30, %v229_v30  ;;  %v234_v34 = vmul.f32 %v230_v31, %v230_v31  ;;  %v235_v36 = vmul.f32 %v231_v32, %v231_v32  ;;  %v236_v38 = vmul.f32 %v232_v35, %v232_v35 }
  0x44   : > { %v237_v37 = vadd.f32 %v234_v34, %v233_v33 }
  0x46   : > { %v238_v39 = vadd.f32 %v237_v37, %v235_v36 }
  0x48   : > { %v239_v40 = vadd.f32 %v238_v39, %v236_v38 }
  0x4a   : > { %v240_v41 = vrot.slane %v239_v40, 4 }
  0x4c   : > { %v241_v42 = vadd.f32 %v240_v41, %v239_v40 }
  0x4e   : > { %v242_v43 = vrot.slane %v241_v42, 2 }
  0x50   : > { %v243_v44 = vadd.f32 %v242_v43, %v241_v42 }
  0x52   : > { %v244_v45 = vrot.slane %v243_v44, 1 }
  0x54   : > { %v245_v46 = vadd.f32 %v244_v45, %v243_v44 }
  0x56   : > { %v246_v47 = vmul.f32 %v245_v46, %v227_v28 }
  0x58   : > { %v247_v48 = vadd.f32 1e-05, %v246_v47 }
  0x5a   : > { %533 = vrsqrt.f32 %v247_v48  ;;  %vm254_vm1 = vweird.f32 %v247_v48 }
  0x60   : > { %v534_v49 = vpop.eup %533 }
  0x61   : > { %v249_v50 = vmul.f32 %v534_v49, %v247_v48  ;;  %vm255_vm2 = vweird.f32 %v534_v49 }
  0x62   : > { %vm256_vm3 = vmor %vm254_vm1, %vm255_vm2 }
  0x63   : > { %v250_v51 = vmul.f32 %v534_v49, %v249_v50 }
  0x65   : > { %v251_v52 = vmul.f32 0.5, %v250_v51 }
  0x67   : > { %v252_v53 = vsub.f32 1.5, %v251_v52 }
  0x69   : > { %v253_v54 = vmul.f32 %v534_v49, %v252_v53 }
  0x6b   : > { %v257_v55 = vsel %vm256_vm3, %v534_v49, %v253_v54 }
  0x6c   : > { %v258_v56 = vmul.f32 %v257_v55, %v229_v30  ;;  %v259_v62 = vmul.f32 %v257_v55, %v230_v31  ;;  %v260_v3 = vmul.f32 %v257_v55, %v231_v32  ;;  %v261_v4 = vmul.f32 %v257_v55, %v232_v35 }
  0x85   : > { %v297_v57 = vpop.permute.xlu2 %296 }
  0x8d   : > { %v302_v2 = vpop.permute.xlu2 %301 }
  0x9c   : > { %v279_v58 = vpop.permute.xlu1 %278 }
  0x9d   : > { %v269_v59 = vpop.permute.xlu0 %268  ;;  %v288_v6 = vmul.f32 %v279_v58, %v260_v3 }
  0x9e   : > { %v286_v60 = vmul.f32 %v269_v59, %v258_v56 }
  0xa0   : > { %v314_v61 = vadd.f32 %v297_v57, %v286_v60 }
  0xa2   : > { %318 = vst [vmem:[%s207_s5] sm:$0xff] %v314_v61 }
  0xa4   : > { %v284_v63 = vpop.permute.xlu1 %283 }
  0xa5   : > { %v274_v0 = vpop.permute.xlu0 %273  ;;  %v289_v7 = vmul.f32 %v284_v63, %v261_v4 }
  0xa6   : > { %v287_v1 = vmul.f32 %v274_v0, %v259_v62 }
  0xa8   : > { %v315_v5 = vadd.f32 %v302_v2, %v287_v1 }
  0xaa   : > { %319 = vst [vmem:[%s207_s5 + $0x8] sm:$0xff] %v315_v5 }
  0xac   : > { %v312_v8 = vpop.permute.xlu1 %311 }
  0xad   : > { %v307_v9 = vpop.permute.xlu0 %306  ;;  %v317_v10 = vadd.f32 %v312_v8, %v289_v7 }
  0xae   : > { %v316_v11 = vadd.f32 %v307_v9, %v288_v6 }
  0xaf   : > { %321 = vst [vmem:[%s207_s5 + $0x18] sm:$0xff] %v317_v10 }
  0xb0   : > { %320 = vst [vmem:[%s207_s5 + $0x10] sm:$0xff] %v316_v11 }
  0xb1   : > { %592 = shalt.err (!%p589_p11)
}
  0xb2   : > { %s670_s7 = smov 128   ;;  %s671_s23 = smov 256  }
  0xb3   : > { %s672_s9 = smov 8  }
  0xb4   : > { %444 = dma.vmem_to_hbm [thread:$0]  (%p758_p9), %s337_s16, 512, %s339_s21, %s323_s15, %s670_s7, %s671_s23, %s672_s9  }
  0xb5 PF: > { %p455_p13 = scmp.ge.s32.totalorder %s663_s19, 2  ;;  %s353_s5 = sand.u32 1, %s635_s12  }
  0xb6   : > { %s354_s6 = scalar_lea.sflag [#allocation4], %s353_s5 }
  0xb7   : > { %p451_p0 = pnand %p455_p13, %p764_p12 }
  0xb9   : > { %p452_p1 = pneg %p451_p0 }
  0xbb   : > { %630 = dma.done.wait (%p452_p1), %s354_s6, 512  }
  0xbc   : > { %632 = vsyncadd (%p452_p1), %s354_s6, 4294966784  ;;  %s19_s19 = sadd.s32 1, %s663_s19   ;;  %s876_s10 = sld [smem:[#allocation10_spill]] }
  0xbd   : > { %p16_p2 = scmp.ge.s32.totalorder %s19_s19, 6   ;;  %s877_s28 = sld [smem:[#allocation8_spill]] }
  0xbe   : > { %s878_s11 = sld [smem:[#allocation9_spill]]  ;;  %s879_s12 = smov %s639_s13 }
  0xbf   : > { %s880_s13 = smov %s643_s14  ;;  %s882_s15 = smov %s655_s17 }
  0xc0   : > { %s883_s16 = smov %s659_s18  ;;  %18 = sbr.rel (!%p16_p2) target bundleno = 7 (0x7), region = 77 }
  0xc2   : > { %s881_s14 = smov %s876_s10 }
  0xc3   : > { %s884_s17 = smov %s877_s28 }
  0xc4   : > { %s885_s18 = smov %s878_s11 }
  0xc5   :  { %360 = vsyncpa [#allocation3], 1 }
  0xc6   :  { %362 = vsyncpa [#allocation3 + $0x1], 1 }
  0xc7   :  { %363 = vsyncpa [#allocation4], 1 }
  0xc8   :  { %365 = vsyncpa [#allocation4 + $0x1], 1 }

</bundles_post_ra>
